<compile_context>
chip_gen: v7x
topology: tpu7x:2x2x1
jax: 0.10.0
libtpu: 0.0.40
codegen_flags: <defaults>
</compile_context>

<pallas_src>
import functools

import numpy as np
import jax
import jax.numpy as jnp
from jax import lax
from jax.experimental import pallas as pl
from jax.experimental.pallas import tpu as pltpu

LATENT_DIM = 512


def _adain_kernel(x_ref, s_ref, b_ref, o_ref, *, eps):
    # x_ref : (1, tc, HW)  activations for one sample / channel tile (lane-dense)
    # s_ref : (1, tc, 1)   precomputed per-channel style scale for this sample
    # b_ref : (1, tc, 1)   precomputed per-channel style bias for this sample
    x = x_ref[0].astype(jnp.float32)                       # (tc, HW)

    # Instance norm over the flattened spatial (lane) axis, biased variance.
    mean = jnp.mean(x, axis=-1, keepdims=True)             # (tc, 1)
    xc = x - mean
    var = jnp.mean(xc * xc, axis=-1, keepdims=True)        # (tc, 1) two-pass (stable)

    # Fused affine: out = xc * (rsqrt(var+eps) * style_s) + style_b  -- one FMA pass.
    a = lax.rsqrt(var + eps) * s_ref[0]                    # (tc, 1)
    o_ref[0] = (xc * a + b_ref[0]).astype(o_ref.dtype)


def _tile_budget_bytes():
    """Per-tile (x or out) byte budget, generation-aware."""
    try:
        kind = jax.devices()[0].device_kind.lower()
    except Exception:
        kind = ""
    # v5e: 16 MiB default scoped VMEM and lowest HBM BW -> keep tiles at 2 MiB.
    if "v5 lite" in kind or "v5e" in kind or "v5litepod" in kind:
        return 2 << 20
    # v6e / v7x: 32 MiB default scoped VMEM -> 4 MiB tiles amortize per-step overhead.
    return 4 << 20


def _pick_channel_tile(C, HW, itemsize, B, budget_bytes):
    """Largest dtype-aligned channel tile dividing C with x tile <= budget,
    keeping at least 2 grid steps when possible (megacore / pipeline depth)."""
    min_tc = max(8, 32 // max(itemsize, 1))   # 8 sublanes f32, 16 bf16, 32 int8/fp8
    if C % min_tc != 0:
        return C  # small C: block spans the full channel dim (legal full-extent block)
    tc = min_tc
    while (C % (tc * 2) == 0
           and (tc * 2) * HW * itemsize <= budget_bytes
           and B * (C // (tc * 2)) >= 2):
        tc *= 2
    return tc


def adain_layer(x, w, weight_s, bias_s, weight_b, bias_b,
                *, lr_multiplier=1.0, eps=1e-5):
    """x: (B,C,H,W); w: (B,D); weight_*: (C,D); bias_*: (C,)."""
    B, C, H, W = x.shape
    D = w.shape[-1]
    HW = H * W

    weight_gain = lr_multiplier * (np.sqrt(2.0) / np.sqrt(D))
    bias_gain = lr_multiplier

    # Style affines precomputed as one small (B, 2C) MXU matmul outside the kernel;
    # only (B, C) scale/bias tensors (B*C*8 bytes) flow into the kernel.
    w_all = (jnp.concatenate([weight_s, weight_b], axis=0) * weight_gain).astype(jnp.float32)
    b_all = (jnp.concatenate([bias_s, bias_b], axis=0) * bias_gain).astype(jnp.float32)
    styles = jnp.einsum("bd,cd->bc", w.astype(jnp.float32), w_all,
                        precision=lax.Precision.HIGHEST) + b_all       # (B, 2C)
    style_s = styles[:, :C].reshape(B, C, 1)
    style_b = styles[:, C:].reshape(B, C, 1)

    # Lane-dense spatial axis. For typical StyleGAN shapes HW % 128 == 0; otherwise
    # the full-extent HW block is still legal/correct, just not perfectly lane-dense.
    # TODO(synk): pad HW to a multiple of 128 (with masked stats) if odd spatial sizes matter.
    x_flat = x.reshape(B, C, HW)

    itemsize = jnp.dtype(x.dtype).itemsize
    tc = _pick_channel_tile(C, HW, itemsize, B, _tile_budget_bytes())
    grid = (B, C // tc)

    # Explicit VMEM budget: x + out double-buffered, plus margin for the tiny style
    # blocks. Stays well under v7x's 64 MiB physical VMEM.
    tile_bytes = tc * HW * itemsize
    vmem_limit = max(4 * tile_bytes + (4 << 20), 16 << 20)

    out = pl.pallas_call(
        functools.partial(_adain_kernel, eps=eps),
        out_shape=jax.ShapeDtypeStruct((B, C, HW), x.dtype),
        grid=grid,
        in_specs=[
            pl.BlockSpec((1, tc, HW), lambda b, c: (b, c, 0)),
            pl.BlockSpec((1, tc, 1),  lambda b, c: (b, c, 0)),
            pl.BlockSpec((1, tc, 1),  lambda b, c: (b, c, 0)),
        ],
        out_specs=pl.BlockSpec((1, tc, HW), lambda b, c: (b, c, 0)),
        compiler_params=pltpu.CompilerParams(
            dimension_semantics=("parallel", "parallel"),
            vmem_limit_bytes=vmem_limit,
        ),
    )(x_flat, style_s, style_b)
    return out.reshape(B, C, H, W)


def adain_reference(x, w, weight_s, bias_s, weight_b, bias_b,
                    *, lr_multiplier=1.0, eps=1e-5):
    D = w.shape[-1]
    wg = lr_multiplier * (np.sqrt(2.0) / np.sqrt(D))
    bg = lr_multiplier
    style_s = jnp.einsum("bd,cd->bc", w, weight_s * wg,
                         precision=lax.Precision.HIGHEST) + bias_s * bg
    style_b = jnp.einsum("bd,cd->bc", w, weight_b * wg,
                         precision=lax.Precision.HIGHEST) + bias_b * bg
    mean = x.mean(axis=(2, 3), keepdims=True)
    var = x.var(axis=(2, 3), keepdims=True)          # biased, like InstanceNorm2d
    xn = (x - mean) * lax.rsqrt(var + eps)
    return xn * style_s[:, :, None, None] + style_b[:, :, None, None]


if __name__ == "__main__":
    key = jax.random.PRNGKey(0)
    kx, kw, kws, kwb = jax.random.split(key, 4)

    B, C, H, W = 2, 4, 16, 16
    D = LATENT_DIM

    x = jax.random.normal(kx, (B, C, H, W), dtype=jnp.float32)
    w = jax.random.normal(kw, (B, D), dtype=jnp.float32)

    # Module __init__: weight = randn(C, D) / lr_multiplier; bias_s init 1.0, bias_b init 0.0
    weight_s = jax.random.normal(kws, (C, D), dtype=jnp.float32)
    bias_s = jnp.full((C,), 1.0, dtype=jnp.float32)
    weight_b = jax.random.normal(kwb, (C, D), dtype=jnp.float32)
    bias_b = jnp.zeros((C,), dtype=jnp.float32)

    out = jax.block_until_ready(adain_layer(x, w, weight_s, bias_s, weight_b, bias_b))
    ref = adain_reference(x, w, weight_s, bias_s, weight_b, bias_b)

    assert out.shape == (B, C, H, W)
    max_diff = float(jnp.max(jnp.abs(out - ref)))
    assert jnp.allclose(out, ref, atol=1e-4, rtol=1e-4), f"max abs diff {max_diff}"

    print("KERNEL_OK")
</pallas_src>

<mosaic_0001>
module attributes {stable_mosaic.version = 11 : i64} {
  func.func @_adain_kernel(%arg0: i32, %arg1: i32, %arg2: memref<1x4x256xf32, #tpu.memory_space<vmem>>, %arg3: memref<1x4x1xf32, #tpu.memory_space<vmem>>, %arg4: memref<1x4x1xf32, #tpu.memory_space<vmem>>, %arg5: memref<1x4x256xf32, #tpu.memory_space<vmem>>) attributes {dimension_semantics = [#tpu.dimension_semantics<parallel>, #tpu.dimension_semantics<parallel>], iteration_bounds = array<i64: 2, 1>, scalar_prefetch = 0 : i64, scratch_operands = 0 : i64, tpu.core_type = #tpu.core_type<tc>, window_params = [{transform_indices = @transform_0, window_bounds = array<i64: 1, 4, 256>}, {transform_indices = @transform_1, window_bounds = array<i64: 1, 4, 1>}, {transform_indices = @transform_2, window_bounds = array<i64: 1, 4, 1>}, {transform_indices = @transform_3, window_bounds = array<i64: 1, 4, 256>}]} {
    %c0 = arith.constant 0 : index
    %c0_0 = arith.constant 0 : index
    %c0_1 = arith.constant 0 : index
    %0 = vector.load %arg2[%c0, %c0_0, %c0_1] : memref<1x4x256xf32, #tpu.memory_space<vmem>>, vector<1x4x256xf32>
    %1 = vector.shape_cast %0 : vector<1x4x256xf32> to vector<4x256xf32>
    %cst = arith.constant dense<0.000000e+00> : vector<4xf32>
    %2 = vector.multi_reduction <add>, %1, %cst [1] : vector<4x256xf32> to vector<4xf32>
    %3 = vector.shape_cast %2 : vector<4xf32> to vector<4x1xf32>
    %cst_2 = arith.constant 2.560000e+02 : f32
    %4 = vector.broadcast %cst_2 : f32 to vector<4x1xf32>
    %5 = arith.divf %3, %4 : vector<4x1xf32>
    %6 = vector.broadcast %5 : vector<4x1xf32> to vector<4x256xf32>
    %7 = arith.subf %1, %6 : vector<4x256xf32>
    %8 = arith.mulf %7, %7 : vector<4x256xf32>
    %cst_3 = arith.constant dense<0.000000e+00> : vector<4xf32>
    %9 = vector.multi_reduction <add>, %8, %cst_3 [1] : vector<4x256xf32> to vector<4xf32>
    %10 = vector.shape_cast %9 : vector<4xf32> to vector<4x1xf32>
    %cst_4 = arith.constant 2.560000e+02 : f32
    %11 = vector.broadcast %cst_4 : f32 to vector<4x1xf32>
    %12 = arith.divf %10, %11 : vector<4x1xf32>
    %cst_5 = arith.constant 9.99999974E-6 : f32
    %13 = vector.broadcast %cst_5 : f32 to vector<4x1xf32>
    %14 = arith.addf %12, %13 : vector<4x1xf32>
    %15 = math.rsqrt %14 : vector<4x1xf32>
    %c0_6 = arith.constant 0 : index
    %c0_7 = arith.constant 0 : index
    %c0_8 = arith.constant 0 : index
    %16 = vector.load %arg3[%c0_6, %c0_7, %c0_8] : memref<1x4x1xf32, #tpu.memory_space<vmem>>, vector<1x4x1xf32>
    %17 = vector.shape_cast %16 : vector<1x4x1xf32> to vector<4x1xf32>
    %18 = arith.mulf %15, %17 : vector<4x1xf32>
    %19 = vector.broadcast %18 : vector<4x1xf32> to vector<4x256xf32>
    %20 = arith.mulf %7, %19 : vector<4x256xf32>
    %c0_9 = arith.constant 0 : index
    %c0_10 = arith.constant 0 : index
    %c0_11 = arith.constant 0 : index
    %21 = vector.load %arg4[%c0_9, %c0_10, %c0_11] : memref<1x4x1xf32, #tpu.memory_space<vmem>>, vector<1x4x1xf32>
    %22 = vector.shape_cast %21 : vector<1x4x1xf32> to vector<4x1xf32>
    %23 = vector.broadcast %22 : vector<4x1xf32> to vector<4x256xf32>
    %24 = arith.addf %20, %23 : vector<4x256xf32>
    %c0_12 = arith.constant 0 : index
    %c0_13 = arith.constant 0 : index
    %c0_14 = arith.constant 0 : index
    %25 = vector.load %arg5[%c0_12, %c0_13, %c0_14] : memref<1x4x256xf32, #tpu.memory_space<vmem>>, vector<1x4x256xf32>
    %26 = vector.shape_cast %25 : vector<1x4x256xf32> to vector<4x256xf32>
    %27 = vector.shape_cast %24 : vector<4x256xf32> to vector<1x4x256xf32>
    tpu.vector_store %arg5[%c0_12, %c0_13, %c0_14], %27 {strides = array<i32>} : memref<1x4x256xf32, #tpu.memory_space<vmem>>, vector<1x4x256xf32>,
    return
  }
  func.func @transform_0(%arg0: i32, %arg1: i32) -> (i32, i32, i32) {
    %c0_i32 = arith.constant 0 : i32
    %c0_i32_0 = arith.constant 0 : i32
    return %arg0, %arg1, %c0_i32 : i32, i32, i32
  }
  func.func @transform_1(%arg0: i32, %arg1: i32) -> (i32, i32, i32) {
    %c0_i32 = arith.constant 0 : i32
    %c0_i32_0 = arith.constant 0 : i32
    return %arg0, %arg1, %c0_i32 : i32, i32, i32
  }
  func.func @transform_2(%arg0: i32, %arg1: i32) -> (i32, i32, i32) {
    %c0_i32 = arith.constant 0 : i32
    %c0_i32_0 = arith.constant 0 : i32
    return %arg0, %arg1, %c0_i32 : i32, i32, i32
  }
  func.func @transform_3(%arg0: i32, %arg1: i32) -> (i32, i32, i32) {
    %c0_i32 = arith.constant 0 : i32
    %c0_i32_0 = arith.constant 0 : i32
    return %arg0, %arg1, %c0_i32 : i32, i32, i32
  }
}

</mosaic_0001>

<bundles_post_ra>
// kernel: tpu_custom_call.1
= control target key start
LH: loop header
LB: loop body
LE: loop exit
PB: predicated region body
PF: predicated region fallthrough
CT: control target
= control target key end

     0   :  { %8 = vsyncpa [#allocation3], 0  ;;  %s751_s0 = inlined_call_operand.vmem [shape: f32[2,4,256], index: 0, kind: input, shape index: {}]   ;;  %s752_s1 = inlined_call_operand.vmem [shape: f32[2,4,1], index: 1, kind: input, shape index: {}]   ;;  %s753_s2 = inlined_call_operand.vmem [shape: f32[2,4,1], index: 2, kind: input, shape index: {}]   ;;  %s754_s3 = inlined_call_operand.hbm [shape: f32[2,4,256], index: 3, kind: output, shape index: {}]  }
   0x1   :  { %10 = vsyncpa [#allocation3 + $0x1], 0  ;;  %s625_s12 = smov 0   ;;  %s627_s13 = smov 0  }
   0x2   :  { %s629_s14 = smov 0   ;;  %s631_s15 = smov 0  }
   0x3   :  { %s633_s16 = smov 0   ;;  %s635_s17 = smov 0  }
   0x4 LB: > { %s443_s18 = sadd.s32 4294967295, %s600_s17   ;;  %s444_s19 = sadd.s32 4294967294, %s600_s17   ;;  %s600_s17 = sphi %s635_s17, %s16_s17   ;;  %s596_s16 = sphi %s633_s16, %s761_s16   ;;  %s592_s15 = sphi %s631_s15, %s760_s15   ;;  %s588_s14 = sphi %s629_s14, %s759_s14   ;;  %s584_s13 = sphi %s627_s13, %s758_s13   ;;  %s580_s12 = sphi %s625_s12, %s757_s12  }
   0x5   : > { %s28_s20 = sadd.s32 1, %s596_s16  ;;  %s121_s21 = sadd.s32 1, %s588_s14 }
   0x6   : > { %p30_p0 = scmp.ge.s32.totalorder %s28_s20, 2  ;;  %p131_p1 = scmp.ne.s32.totalorder %s588_s14, %s584_s13 }
   0x7   : > { %p132_p2 = scmp.eq.s32.totalorder %s443_s18, 1  ;;  %p137_p3 = scmp.ne.s32.totalorder %s584_s13, %s580_s12 }
   0x8   : > { %s763_s20 = smov (%p30_p0, %s28_s20), 0  ;;  %p138_p5 = scmp.eq.s32.totalorder %s444_s19, 1 }
   0x9   : > { %p665_p4 = por %p132_p2, %p131_p1  ;;  %s116_s23 = ssub.s32 %s596_s16, %s763_s20 }
   0xa   : > { %p447_p6 = scmp.ge.s32.totalorder %s600_s17, 1  ;;  %p119_p7 = scmp.eq.s32.totalorder %s116_s23, 0 }
   0xb   : > { %p672_p8 = por %p138_p5, %p137_p3  ;;  %p188_p9 = scmp.lt.s32.totalorder %s600_s17, 3 }
   0xc   : > { %s678_s25 = scalar_select %p119_p7, %s588_s14, %s121_s21  }
   0xd   : > { %p189_p10 = pnand %p447_p6, %p188_p9 }
   0xe   : > { %p230_p11 = scmp.lt.s32.totalorder (!%p189_p10), %s592_s15, 1  ;;  %vm257_vm0 = vcmask (!%p189_p10), 1043456   ;;  %v602_v5 = vmov (!%p189_p10), 839922192   ;;  %v269_v7 = vlaneseq (!%p189_p10)  ;;  %v603_v20 = vmov (!%p189_p10), 0   ;;  %s227_s11 = sand.u32 (!%p189_p10), 1, %s584_s13  }
   0xf   : > { %192 = sbr.rel (%p189_p10) target bundleno = 496 (0x1f0), region = 32  ;;  %v267_v6 = vunpack.c.l.s4 (!%p189_p10), %v602_v5  ;;  %517 = vset.pattern.permute.xlu1 (!%p189_p10), %v603_v20  ;;  %518 = vset.pattern.permute.xlu0 (!%p189_p10), %v603_v20  ;;  %s448_s18 = sshll.u32 (!%p189_p10), %s227_s11, 3 }
  0x10   : > { %v270_v9 = vshrl.u32 (!%p189_p10), %v269_v7, 7  ;;  %s459_s19 = sshll.u32 (!%p189_p10), %s592_s15, 7  ;;  %s229_s21 = scalar_lea.vmem (!%p189_p10), [#allocation2], %s448_s18 }
  0x11   : > { %v268_v8 = vunpack.c.0.s8 (!%p189_p10), %v267_v6  ;;  %s334_s23 = sshll.u32 (!%p189_p10), %s229_s21, 4  ;;  %s704_s28 = scalar_lea.hbm (!%p189_p10), %s754_s3, %s459_s19  ;;  %s706_s23 = int_to_ptr.vmem [resolvable:$true] %s334_s23 }
  0x12   : > { %s318_s29 = scalar_lea.sflag (!%p189_p10), [#allocation3], %s227_s11 }
  0x13   : > { %v271_v10 = vsub.s32 (!%p189_p10), %v268_v8, %v270_v9 }
  0x16   : > { %s682_s26 = scalar_select %p230_p11, %s592_s15, 1 }
  0x17   : > { %s604_s15 = smov [#allocation2]  }
  0x18   : > { %s458_s27 = sshll.u32 %s682_s26, 3  ;;  %s451_s4 = sshll.u32 %s682_s26, 2 }
  0x19   : > { %s238_s30 = scalar_lea.vmem %s751_s0, %s458_s27  ;;  %s245_s7 = scalar_lea.vmem %s752_s1, %s451_s4 }
  0x1a   : > { %v253_v0 = vld [vmem:[%s238_s30] sm:$0xff]  ;;  %s252_s10 = scalar_lea.vmem %s753_s2, %s451_s4  ;;  %s522_s30 = scalar_lea.vmem %s706_s23, 128 }
  0x1b   : > { %v255_v1 = vcombine.high %v253_v0, %v253_v0  ;;  %v258_v2 = vsel %vm257_vm0, %v253_v0, 0.0  ;;  %v287_v24 = vld [vmem:[%s245_s7] sm:$0xf]  ;;  %p523_p12 = scmp.ne.s32.totalorder %s706_s23, %s522_s30  ;;  %s526_s4 = sshll.u32 %s604_s15, 4  ;;  %s527_s4 = int_to_ptr.vmem [resolvable:$false] %s526_s4 }
  0x1c   : > { %v302_v27 = vld [vmem:[%s252_s10] sm:$0xf]  ;;  %s528_s5 = scalar_lea.vmem %s527_s4, 256  ;;  %p529_p1 = scmp.lt.s32.totalorder %s706_s23, %s527_s4 }
  0x1d   : > { %v259_v3 = vsel %vm257_vm0, %v255_v1, 0.0  ;;  %p524_p13 = pnand %p523_p12, %p665_p4  ;;  %p530_p2 = scmp.lt.s32.totalorder %s528_s5, %s522_s30 }
  0x1e   : > { %v260_v4 = vadd.f32 %v259_v3, %v258_v2 }
  0x1f   : > { %p525_p0 = pneg %p524_p13  ;;  %p531_p3 = por %p530_p2, %p529_p1 }
  0x20   : > { %261 = vadd.xlane.f32.xlu0 %v260_v4 }
  0x21   : > { %p532_p5 = pnand %p531_p3, %p525_p0 }
  0xad   : > { %v262_v11 = vpop.xlane.xlu0 %261 }
  0xae   : > { %v264_v12 = vmul.f32 0.00390625, %v262_v11 }
  0xb0   : > { %v272_v13 = vrot.slane %v264_v12, %v271_v10 }
  0xb2   : > { %v274_v14 = vsub.f32 %v253_v0, %v272_v13 }
  0xb4   : > { %v275_v15 = vmul.f32 %v274_v14, %v274_v14 }
  0xb6   : > { %v277_v16 = vcombine.high %v275_v15, %v275_v15  ;;  %v279_v17 = vsel %vm257_vm0, %v275_v15, 0.0 }
  0xb8   : > { %v280_v18 = vsel %vm257_vm0, %v277_v16, 0.0 }
  0xb9   : > { %v281_v19 = vadd.f32 %v280_v18, %v279_v17 }
  0xbb   : > { %282 = vadd.xlane.f32.xlu0 %v281_v19 }
 0x148   : > { %v283_v21 = vpop.xlane.xlu0 %282 }
 0x149   : > { %v284_v22 = vmul.f32 0.00390625, %v283_v21 }
 0x14b   : > { %v285_v23 = vadd.f32 1e-05, %v284_v22 }
 0x14d   : > { %520 = vrsqrt.f32 %v285_v23 }
 0x157   : > { %v521_v25 = vpop.eup %520 }
 0x158   : > { %v288_v26 = vmul.f32 %v521_v25, %v287_v24 }
 0x15a   : > { %291 = vperm.xlu1 %517, %v288_v26  }
 0x15e   : > { %305 = vperm.xlu1 %517, %v302_v27  }
 0x1d9   : > { %v292_v28 = vpop.permute.xlu1 %291 }
 0x1da   : > { %v299_v29 = vrot.slane %v292_v28, %v271_v10 }
 0x1dc   : > { %v301_v31 = vmul.f32 %v299_v29, %v274_v14 }
 0x1dd   : > { %v306_v30 = vpop.permute.xlu1 %305 }
 0x1de   : > { %v313_v32 = vrot.slane %v306_v30, %v271_v10 }
 0x1e0   : > { %v315_v33 = vadd.f32 %v313_v32, %v301_v31 }
 0x1e2   : > { %316 = vst [vmem:[%s229_s21] sm:$0xff] %v315_v33 }
 0x1e3   : > { %535 = shalt.err (!%p532_p5)
}
 0x1e4   : > { %s536_s6 = scalar_lea.hbm %s704_s28, 128  ;;  %s540_s9 = scalar_lea.hbm %s754_s3, 256 }
 0x1e5   : > { %p537_p6 = scmp.ne.s32.totalorder %s704_s28, %s536_s6  ;;  %p541_p10 = scmp.lt.u32.totalorder %s704_s28, %s754_s3 }
 0x1e6   : > { %p542_p11 = scmp.lt.u32.totalorder %s540_s9, %s536_s6  ;;  %p544_p13 = scmp.lt.u32.totalorder %s536_s6, %s704_s28 }
 0x1e7   : > { %p538_p7 = pnand %p537_p6, %p665_p4 }
 0x1e8   : > { %p543_p12 = por %p542_p11, %p541_p10 }
 0x1e9   : > { %p539_p9 = pneg %p538_p7 }
 0x1ea   : > { %p545_p0 = por %p544_p13, %p543_p12 }
 0x1ec   : > { %p546_p1 = pnand %p545_p0, %p539_p9 }
 0x1ee   : > { %549 = shalt.err (!%p546_p1)
}
 0x1ef   : > { %460 = dma.vmem_to_hbm [thread:$0]  (%p665_p4), %s706_s23, 128, %s704_s28, %s318_s29  }
 0x1f0 PF: > { %p466_p2 = scmp.ge.s32.totalorder %s600_s17, 2  ;;  %s346_s18 = sand.u32 1, %s580_s12  }
 0x1f1   : > { %s347_s19 = scalar_lea.sflag [#allocation3], %s346_s18 }
 0x1f2   : > { %p463_p3 = pnand %p466_p2, %p672_p8 }
 0x1f4   : > { %575 = dma.done.wait (!%p463_p3), %s347_s19, 128  }
 0x1f5   : > { %577 = vsyncadd (!%p463_p3), %s347_s19, 4294967168  ;;  %s16_s17 = sadd.s32 1, %s600_s17   ;;  %s757_s12 = smov %s584_s13 }
 0x1f6   : > { %p13_p5 = scmp.ge.s32.totalorder %s16_s17, 4   ;;  %s758_s13 = smov %s588_s14 }
 0x1f7   : > { %s759_s14 = smov %s678_s25  ;;  %s760_s15 = smov %s596_s16 }
 0x1f8   : > { %s761_s16 = smov %s763_s20  ;;  %15 = sbr.rel (!%p13_p5) target bundleno = 4 (0x4), region = 73 }
 0x1ff   :  { %352 = vsyncpa [#allocation3], 1 }
 0x200   :  { %354 = vsyncpa [#allocation3 + $0x1], 1 }

</bundles_post_ra>
